<compile_context>
chip_gen: v6e
topology: v6e:2x2x1
jax: 0.10.0
libtpu: 0.0.40
codegen_flags: <defaults>
</compile_context>

<pallas_src>
import functools

import jax
import jax.numpy as jnp
from jax.experimental import pallas as pl
from jax.experimental.pallas import tpu as pltpu


def _round_up(x, m):
    return (x + m - 1) // m * m


# ----------------------------------------------------------------------------
# Parameter packing: stack [W_ih ; W_hh] row-wise, pad each gate block to Hp
# lanes so gate slices inside the kernel are 128-lane aligned.
# ----------------------------------------------------------------------------
def _pack_params(weight_ih, weight_hh, bias, hidden_size, kp, hp, compute_dtype):
    K = weight_ih.shape[0] + weight_hh.shape[0]
    H = hidden_size
    w = jnp.concatenate([weight_ih, weight_hh], axis=0).astype(compute_dtype)  # (K, 3H)
    gate_blocks = []
    for gi in range(3):
        blk = w[:, gi * H:(gi + 1) * H]
        blk = jnp.pad(blk, ((0, kp - K), (0, hp - H)))          # zero pad -> exact
        gate_blocks.append(blk)
    w_packed = jnp.concatenate(gate_blocks, axis=1)             # (Kp, 3*Hp)

    b = bias.reshape(3, H).astype(jnp.float32)
    b_packed = jnp.pad(b, ((0, 0), (0, hp - H))).reshape(1, 3 * hp)   # (1, 3*Hp), f32
    return w_packed, b_packed


# ----------------------------------------------------------------------------
# Single-step kernel.
# ----------------------------------------------------------------------------
def _cell_kernel(xh_ref, c0_ref, w_ref, b_ref, c1_ref, *, hp):
    # One fused MXU matmul with f32 accumulation; bias added once on the VPU.
    gates = jnp.dot(xh_ref[...], w_ref[...],
                    preferred_element_type=jnp.float32) + b_ref[...]
    # Gate blocks are Hp-wide (multiple of 128) -> lane-aligned slices.
    f = gates[:, 0 * hp:1 * hp]
    i = gates[:, 1 * hp:2 * hp]
    g = gates[:, 2 * hp:3 * hp]
    c1 = jax.nn.sigmoid(f) * c0_ref[...] + jax.nn.sigmoid(i) * jnp.tanh(g)
    c1_ref[...] = c1.astype(c1_ref.dtype)


def word_lstm_cell(input_, h_0, c_0, weight_ih, weight_hh, bias, *,
                   compute_dtype=jnp.bfloat16, block_batch=512):
    """Pallas implementation of WordLSTMCell.forward -> c_1."""
    B, I = input_.shape
    H = h_0.shape[1]
    assert weight_ih.shape == (I, 3 * H)
    assert weight_hh.shape == (H, 3 * H)
    K = I + H

    kp = _round_up(K, 128)
    hp = _round_up(H, 128)
    bb = min(block_batch, _round_up(B, 8))       # batch tile (multiple of 8)
    bp = _round_up(B, bb)

    # Fused, padded activations [x | h] in the matmul dtype; c_0 in f32.
    xh = jnp.concatenate([input_, h_0], axis=1).astype(compute_dtype)
    xh = jnp.pad(xh, ((0, bp - B), (0, kp - K)))
    c0 = jnp.pad(c_0.astype(jnp.float32), ((0, bp - B), (0, hp - H)))

    w_packed, b_packed = _pack_params(weight_ih, weight_hh, bias, H, kp, hp,
                                      compute_dtype)

    kernel = functools.partial(_cell_kernel, hp=hp)
    out = pl.pallas_call(
        kernel,
        out_shape=jax.ShapeDtypeStruct((bp, hp), jnp.float32),
        grid_spec=pltpu.PrefetchScalarGridSpec(
            num_scalar_prefetch=0,
            grid=(bp // bb,),
            in_specs=[
                pl.BlockSpec((bb, kp), lambda i: (i, 0)),        # [x|h] batch tile
                pl.BlockSpec((bb, hp), lambda i: (i, 0)),        # c_0 batch tile
                pl.BlockSpec((kp, 3 * hp), lambda i: (0, 0)),    # fused weights (resident)
                pl.BlockSpec((1, 3 * hp), lambda i: (0, 0)),     # bias (resident)
            ],
            out_specs=pl.BlockSpec((bb, hp), lambda i: (i, 0)),
        ),
        compiler_params=pltpu.CompilerParams(
            dimension_semantics=("parallel",)),                  # megacore on v7x
    )(xh, c0, w_packed, b_packed)

    return out[:B, :H].astype(input_.dtype)


# ----------------------------------------------------------------------------
# Multi-step variant: whole time loop inside one pallas_call.
#   c_t = sigmoid(f_t) * c_{t-1} + sigmoid(i_t) * tanh(g_t)
# Weights/bias are DMA'd to VMEM once and stay resident over all T steps;
# the cell state is carried in a VMEM scratch buffer.
# ----------------------------------------------------------------------------
def _seq_kernel(xh_ref, c0_ref, w_ref, b_ref, c_seq_ref, c_scr, *, hp):
    t = pl.program_id(0)

    @pl.when(t == 0)
    def _():
        c_scr[...] = c0_ref[...]

    gates = jnp.dot(xh_ref[0], w_ref[...],
                    preferred_element_type=jnp.float32) + b_ref[...]
    f = gates[:, 0 * hp:1 * hp]
    i = gates[:, 1 * hp:2 * hp]
    g = gates[:, 2 * hp:3 * hp]
    c_new = jax.nn.sigmoid(f) * c_scr[...] + jax.nn.sigmoid(i) * jnp.tanh(g)
    c_scr[...] = c_new
    c_seq_ref[0] = c_new.astype(c_seq_ref.dtype)


def word_lstm_cell_sequence(x_seq, h_seq, c_0, weight_ih, weight_hh, bias, *,
                            compute_dtype=jnp.bfloat16):
    """Run T WordLSTMCell steps in one kernel. Returns (T, B, H) cell states."""
    T, B, I = x_seq.shape
    H = h_seq.shape[2]
    K = I + H
    kp = _round_up(K, 128)
    hp = _round_up(H, 128)
    bp = _round_up(B, 8)

    xh = jnp.concatenate([x_seq, h_seq], axis=2).astype(compute_dtype)   # (T, B, K)
    xh = jnp.pad(xh, ((0, 0), (0, bp - B), (0, kp - K)))
    c0 = jnp.pad(c_0.astype(jnp.float32), ((0, bp - B), (0, hp - H)))
    w_packed, b_packed = _pack_params(weight_ih, weight_hh, bias, H, kp, hp,
                                      compute_dtype)

    kernel = functools.partial(_seq_kernel, hp=hp)
    out = pl.pallas_call(
        kernel,
        out_shape=jax.ShapeDtypeStruct((T, bp, hp), jnp.float32),
        grid_spec=pltpu.PrefetchScalarGridSpec(
            num_scalar_prefetch=0,
            grid=(T,),
            in_specs=[
                pl.BlockSpec((1, bp, kp), lambda t: (t, 0, 0)),   # per-step [x|h]
                pl.BlockSpec((bp, hp), lambda t: (0, 0)),         # c_0 (used at t==0)
                pl.BlockSpec((kp, 3 * hp), lambda t: (0, 0)),     # weights: DMA once
                pl.BlockSpec((1, 3 * hp), lambda t: (0, 0)),      # bias:    DMA once
            ],
            out_specs=pl.BlockSpec((1, bp, hp), lambda t: (t, 0, 0)),
            scratch_shapes=[pltpu.VMEM((bp, hp), jnp.float32)],   # carried cell state
        ),
        compiler_params=pltpu.CompilerParams(
            dimension_semantics=("arbitrary",)),                  # sequential recurrence
    )(xh, c0, w_packed, b_packed)

    return out[:, :B, :H].astype(x_seq.dtype)


# ----------------------------------------------------------------------------
# Host-side helpers + self-check.
# ----------------------------------------------------------------------------
def init_params(key, input_size, hidden_size, dtype=jnp.float32):
    """Parameter init mirroring WordLSTMCell.reset_parameters() (nonzero bias
    used here only to exercise the bias path)."""
    k_w, k_b = jax.random.split(key)
    w_ih = jax.nn.initializers.orthogonal()(k_w, (input_size, 3 * hidden_size), dtype)
    w_hh = jnp.tile(jnp.eye(hidden_size, dtype=dtype), (1, 3))
    b = 0.1 * jax.random.normal(k_b, (3 * hidden_size,), dtype=dtype)
    return w_ih, w_hh, b


def _reference_step(x, h, c, w_ih, w_hh, b):
    gates = x @ w_ih + h @ w_hh + b[None, :]
    f, i, g = jnp.split(gates, 3, axis=1)
    return jax.nn.sigmoid(f) * c + jax.nn.sigmoid(i) * jnp.tanh(g)


if __name__ == "__main__":
    batch, input_size, hidden_size, seq_len = 4, 24, 32, 6

    key = jax.random.PRNGKey(0)
    k_p, k_x, k_h, k_c, k_xs, k_hs = jax.random.split(key, 6)
    weight_ih, weight_hh, bias = init_params(k_p, input_size, hidden_size)

    x = jax.random.normal(k_x, (batch, input_size), dtype=jnp.float32)
    h0 = jax.random.normal(k_h, (batch, hidden_size), dtype=jnp.float32)
    c0 = jax.random.normal(k_c, (batch, hidden_size), dtype=jnp.float32)

    # --- single step, f32 matmul path (tight semantics check) ----------------
    c1_f32 = jax.block_until_ready(
        word_lstm_cell(x, h0, c0, weight_ih, weight_hh, bias,
                       compute_dtype=jnp.float32))
    c1_ref = _reference_step(x, h0, c0, weight_ih, weight_hh, bias)
    assert jnp.allclose(c1_f32, c1_ref, atol=1e-4, rtol=1e-4), \
        float(jnp.max(jnp.abs(c1_f32 - c1_ref)))

    # --- single step, bf16 matmul path (default, MXU-native) -----------------
    c1_bf16 = jax.block_until_ready(
        word_lstm_cell(x, h0, c0, weight_ih, weight_hh, bias))
    assert jnp.allclose(c1_bf16, c1_ref, atol=1e-1, rtol=1e-1), \
        float(jnp.max(jnp.abs(c1_bf16 - c1_ref)))

    # --- full sequence inside one pallas_call (weights VMEM-resident) --------
    x_seq = jax.random.normal(k_xs, (seq_len, batch, input_size), dtype=jnp.float32)
    h_seq = jax.random.normal(k_hs, (seq_len, batch, hidden_size), dtype=jnp.float32)
    c_seq = jax.block_until_ready(
        word_lstm_cell_sequence(x_seq, h_seq, c0, weight_ih, weight_hh, bias,
                                compute_dtype=jnp.float32))

    def _scan_step(c, xh_t):
        xt, ht = xh_t
        c_new = _reference_step(xt, ht, c, weight_ih, weight_hh, bias)
        return c_new, c_new

    _, c_seq_ref = jax.lax.scan(_scan_step, c0, (x_seq, h_seq))
    assert jnp.allclose(c_seq, c_seq_ref, atol=1e-4, rtol=1e-3), \
        float(jnp.max(jnp.abs(c_seq - c_seq_ref)))

    print("KERNEL_OK")
</pallas_src>

<mosaic_0001>
module attributes {stable_mosaic.version = 11 : i64} {
  func.func @_cell_kernel(%arg0: i32, %arg1: memref<8x128xf32, #tpu.memory_space<vmem>>, %arg2: memref<8x128xf32, #tpu.memory_space<vmem>>, %arg3: memref<128x384xf32, #tpu.memory_space<vmem>>, %arg4: memref<1x384xf32, #tpu.memory_space<vmem>>, %arg5: memref<8x128xf32, #tpu.memory_space<vmem>>) attributes {dimension_semantics = [#tpu.dimension_semantics<parallel>], iteration_bounds = array<i64: 1>, scalar_prefetch = 0 : i64, scratch_operands = 0 : i64, tpu.core_type = #tpu.core_type<tc>, window_params = [{transform_indices = @transform_0, window_bounds = array<i64: 8, 128>}, {transform_indices = @transform_1, window_bounds = array<i64: 8, 128>}, {pipeline_mode = #tpu.pipeline_mode<synchronous>, transform_indices = @transform_2, window_bounds = array<i64: 128, 384>}, {pipeline_mode = #tpu.pipeline_mode<synchronous>, transform_indices = @transform_3, window_bounds = array<i64: 1, 384>}, {transform_indices = @transform_4, window_bounds = array<i64: 8, 128>}]} {
    %c0 = arith.constant 0 : index
    %c0_0 = arith.constant 0 : index
    %0 = vector.load %arg1[%c0, %c0_0] : memref<8x128xf32, #tpu.memory_space<vmem>>, vector<8x128xf32>
    %c0_1 = arith.constant 0 : index
    %c0_2 = arith.constant 0 : index
    %1 = vector.load %arg3[%c0_1, %c0_2] : memref<128x384xf32, #tpu.memory_space<vmem>>, vector<128x384xf32>
    %cst = arith.constant dense<0.000000e+00> : vector<8x384xf32>
    %2 = tpu.matmul %0, %1, %cst {dimension_numbers = #tpu.dot_dimension_numbers<[1], [0], [0], [1], [0, 0, 1, 1], [], []>} : vector<8x128xf32>, vector<128x384xf32>, vector<8x384xf32> -> vector<8x384xf32>
    %c0_3 = arith.constant 0 : index
    %c0_4 = arith.constant 0 : index
    %3 = vector.load %arg4[%c0_3, %c0_4] : memref<1x384xf32, #tpu.memory_space<vmem>>, vector<1x384xf32>
    %4 = vector.broadcast %3 : vector<1x384xf32> to vector<8x384xf32>
    %5 = arith.addf %2, %4 : vector<8x384xf32>
    %6 = vector.extract_strided_slice %5 {offsets = [0, 0], sizes = [8, 128], strides = [1, 1]} : vector<8x384xf32> to vector<8x128xf32>
    %7 = vector.extract_strided_slice %5 {offsets = [0, 128], sizes = [8, 128], strides = [1, 1]} : vector<8x384xf32> to vector<8x128xf32>
    %8 = vector.extract_strided_slice %5 {offsets = [0, 256], sizes = [8, 128], strides = [1, 1]} : vector<8x384xf32> to vector<8x128xf32>
    %9 = arith.negf %6 : vector<8x128xf32>
    %10 = math.exp %9 : vector<8x128xf32>
    %cst_5 = arith.constant 1.000000e+00 : f32
    %11 = vector.broadcast %cst_5 : f32 to vector<8x128xf32>
    %12 = arith.addf %11, %10 : vector<8x128xf32>
    %13 = arith.divf %11, %12 : vector<8x128xf32>
    %c0_6 = arith.constant 0 : index
    %c0_7 = arith.constant 0 : index
    %14 = vector.load %arg2[%c0_6, %c0_7] : memref<8x128xf32, #tpu.memory_space<vmem>>, vector<8x128xf32>
    %15 = arith.mulf %13, %14 : vector<8x128xf32>
    %16 = arith.negf %7 : vector<8x128xf32>
    %17 = math.exp %16 : vector<8x128xf32>
    %cst_8 = arith.constant 1.000000e+00 : f32
    %18 = vector.broadcast %cst_8 : f32 to vector<8x128xf32>
    %19 = arith.addf %18, %17 : vector<8x128xf32>
    %20 = arith.divf %18, %19 : vector<8x128xf32>
    %21 = math.tanh %8 : vector<8x128xf32>
    %22 = arith.mulf %20, %21 : vector<8x128xf32>
    %23 = arith.addf %15, %22 : vector<8x128xf32>
    %c0_9 = arith.constant 0 : index
    %c0_10 = arith.constant 0 : index
    %24 = vector.load %arg5[%c0_9, %c0_10] : memref<8x128xf32, #tpu.memory_space<vmem>>, vector<8x128xf32>
    tpu.vector_store %arg5[%c0_9, %c0_10], %23 {strides = array<i32>} : memref<8x128xf32, #tpu.memory_space<vmem>>, vector<8x128xf32>,
    return
  }
  func.func @transform_0(%arg0: i32) -> (i32, i32) {
    %c0_i32 = arith.constant 0 : i32
    %c0_i32_0 = arith.constant 0 : i32
    return %arg0, %c0_i32 : i32, i32
  }
  func.func @transform_1(%arg0: i32) -> (i32, i32) {
    %c0_i32 = arith.constant 0 : i32
    %c0_i32_0 = arith.constant 0 : i32
    return %arg0, %c0_i32 : i32, i32
  }
  func.func @transform_2(%arg0: i32) -> (i32, i32) {
    %c0_i32 = arith.constant 0 : i32
    %c0_i32_0 = arith.constant 0 : i32
    %c0_i32_1 = arith.constant 0 : i32
    return %c0_i32, %c0_i32_0 : i32, i32
  }
  func.func @transform_3(%arg0: i32) -> (i32, i32) {
    %c0_i32 = arith.constant 0 : i32
    %c0_i32_0 = arith.constant 0 : i32
    %c0_i32_1 = arith.constant 0 : i32
    return %c0_i32, %c0_i32_0 : i32, i32
  }
  func.func @transform_4(%arg0: i32) -> (i32, i32) {
    %c0_i32 = arith.constant 0 : i32
    %c0_i32_0 = arith.constant 0 : i32
    return %arg0, %c0_i32 : i32, i32
  }
}

</mosaic_0001>

<bundles_post_ra>
// kernel: tpu_custom_call.1
= control target key start
LH: loop header
LB: loop body
LE: loop exit
PB: predicated region body
PF: predicated region fallthrough
CT: control target
= control target key end

     0   :  { %9 = vsyncpa [#allocation3], 0  ;;  %s520_s0 = inlined_call_operand.hbm [shape: f32[8,128], index: 0, kind: input, shape index: {}]   ;;  %s521_s1 = inlined_call_operand.hbm [shape: f32[8,128], index: 1, kind: input, shape index: {}]   ;;  %s522_s2 = inlined_call_operand.hbm [shape: f32[128,384], index: 2, kind: input, shape index: {}]   ;;  %s523_s3 = inlined_call_operand.vmem [shape: f32[1,384], index: 3, kind: input, shape index: {}]   ;;  %s524_s4 = inlined_call_operand.hbm [shape: f32[8,128], index: 4, kind: output, shape index: {}]  }
   0x1   :  { %10 = vsyncpa [#allocation6], 0 }
   0x2   :  { %11 = vsyncpa [#allocation4], 0  ;;  %s454_s15 = smov [#allocation5]   ;;  %s455_s17 = smov [#allocation2]  }
   0x3   :  { %s28_s16 = sshll.u32 %s454_s15, 4  ;;  %s18_s18 = sshll.u32 %s455_s17, 4  ;;  %s29_s16 = int_to_ptr.vmem [resolvable:$true] %s28_s16  ;;  %s19_s18 = int_to_ptr.vmem [resolvable:$true] %s18_s18 }
   0x4   :  { %s376_s19 = scalar_lea.vmem %s29_s16, 128  ;;  %p381_p1 = scmp.lt.s32.totalorder %s29_s16, %s29_s16 }
   0x5   :  { %p377_p0 = scmp.ne.s32.totalorder %s29_s16, %s376_s19  ;;  %p382_p2 = scmp.lt.s32.totalorder %s376_s19, %s376_s19 }
   0x7   :  { %p383_p3 = por %p382_p2, %p381_p1 }
   0x9   :  { %p384_p4 = pnand %p383_p3, %p377_p0 }
   0xb   :  { %387 = shalt.err (!%p384_p4)
}
   0xc   :  { %31 = dma.hbm_to_vmem [thread:$0]  %s521_s1, 128, %s29_s16, [#allocation6]  }
   0xd   :  { %s396_s22 = scalar_lea.vmem %s19_s18, 128  ;;  %p401_p6 = scmp.lt.s32.totalorder %s19_s18, %s19_s18 }
   0xe   :  { %p397_p5 = scmp.ne.s32.totalorder %s19_s18, %s396_s22  ;;  %p402_p7 = scmp.lt.s32.totalorder %s396_s22, %s396_s22 }
  0x10   :  { %p403_p8 = por %p402_p7, %p401_p6 }
  0x12   :  { %p404_p9 = pnand %p403_p8, %p397_p5 }
  0x14   :  { %407 = shalt.err (!%p404_p9)
}
  0x15   :  { %21 = dma.hbm_to_vmem [thread:$0]  %s520_s0, 128, %s19_s18, [#allocation3]  }
  0x16   :  { %s456_s25 = smov [#allocation7]  }
  0x17   :  { %s37_s26 = sshll.u32 %s456_s25, 4  ;;  %s38_s26 = int_to_ptr.vmem [resolvable:$true] %s37_s26 }
  0x18   :  { %s416_s27 = scalar_lea.vmem %s38_s26, 6144  ;;  %p421_p11 = scmp.lt.s32.totalorder %s38_s26, %s38_s26 }
  0x19   :  { %p417_p10 = scmp.ne.s32.totalorder %s38_s26, %s416_s27  ;;  %p422_p12 = scmp.lt.s32.totalorder %s416_s27, %s416_s27 }
  0x1b   :  { %p423_p13 = por %p422_p12, %p421_p11 }
  0x1d   :  { %p424_p0 = pnand %p423_p13, %p417_p10 }
  0x1f   :  { %427 = shalt.err (!%p424_p0)
}
  0x20   :  { %s457_s1 = smov 384   ;;  %s458_s28 = smov 24  }
  0x21   :  { %43 = dma.hbm_to_vmem [thread:$0]  %s522_s2, 6144, %s38_s26, [#allocation6], %s457_s1, %s457_s1, %s458_s28  }
  0x22   :  { %448 = dma.done.wait [#allocation3], 128  }
  0x23   :  { %449 = vsyncadd [#allocation3], 4294967168 }
  0x24   :  { %450 = dma.done.wait [#allocation6], 6272  }
  0x25   :  { %451 = vsyncadd [#allocation6], 4294961024  ;;  %v459_v0 = vmov 0.0   ;;  %vm460_vm0 = vmmov 0   ;;  %v102_v1 = vld [vmem:[#allocation7 + $0x170] sm:$0xff]  ;;  %v101_v2 = vld [vmem:[#allocation7 + $0x168] sm:$0xff]  ;;  %v106_v50 = vlaneseq }
  0x26   :  { %315 = vmatprep.subr.mxu1 %v459_v0  ;;  %185 = vmatprep.mubr.f32.mxu0 %v459_v0  ;;  %v99_v3 = vld [vmem:[#allocation7 + $0x158] sm:$0xff]  ;;  %v98_v4 = vld [vmem:[#allocation7 + $0x150] sm:$0xff]  ;;  %v96_v5 = vld [vmem:[#allocation7 + $0x140] sm:$0xff] }
  0x27   :  { %347 = vmatprep.mubr.msk.f32.mxu1 %vm460_vm0, %v459_v0  ;;  %121 = vmatprep.subr.mxu0 %v102_v1  ;;  %v95_v6 = vld [vmem:[#allocation7 + $0x138] sm:$0xff]  ;;  %v93_v7 = vld [vmem:[#allocation7 + $0x128] sm:$0xff]  ;;  %v92_v8 = vld [vmem:[#allocation7 + $0x120] sm:$0xff]  ;;  %v107_v51 = vshrl.u32 %v106_v50, 7 }
  0x28   :  { %122 = vmatpush1.msra.mxu0 %v101_v2  ;;  %v90_v9 = vld [vmem:[#allocation7 + $0x110] sm:$0xff]  ;;  %v103_v10 = vld [vmem:[#allocation7 + $0x178] sm:$0xff]  ;;  %v89_v11 = vld [vmem:[#allocation7 + $0x108] sm:$0xff] }
  0x29   :  { %123 = vmatprep.subr.mxu0 %v99_v3  ;;  %316 = vmatpush3.msra.mxu1 %v103_v10  ;;  %v100_v12 = vld [vmem:[#allocation7 + $0x160] sm:$0xff]  ;;  %v87_v13 = vld [vmem:[#allocation7 + $0xf8] sm:$0xff]  ;;  %v97_v14 = vld [vmem:[#allocation7 + $0x148] sm:$0xff]  ;;  %v108_v52 = vsub.s32 0, %v107_v51  ;;  %v112_v54 = vsub.s32 1, %v107_v51  ;;  %v116_v1 = vsub.s32 2, %v107_v51 }
  0x2a   :  { %124 = vmatpush1.msra.mxu0 %v98_v4  ;;  %317 = vmatprep.subr.mxu1 %v459_v0  ;;  %v86_v15 = vld [vmem:[#allocation7 + $0xf0] sm:$0xff]  ;;  %v84_v16 = vld [vmem:[#allocation7 + $0xe0] sm:$0xff]  ;;  %v83_v18 = vld [vmem:[#allocation7 + $0xd8] sm:$0xff] }
  0x2b   :  { %125 = vmatprep.subr.mxu0 %v96_v5  ;;  %318 = vmatpush3.msra.mxu1 %v100_v12  ;;  %v94_v17 = vld [vmem:[#allocation7 + $0x130] sm:$0xff]  ;;  %v81_v19 = vld [vmem:[#allocation7 + $0xc8] sm:$0xff]  ;;  %v91_v20 = vld [vmem:[#allocation7 + $0x118] sm:$0xff] }
  0x2c   :  { %126 = vmatpush1.msra.mxu0 %v95_v6  ;;  %319 = vmatprep.subr.mxu1 %v459_v0  ;;  %v80_v21 = vld [vmem:[#allocation7 + $0xc0] sm:$0xff]  ;;  %v78_v22 = vld [vmem:[#allocation7 + $0xb0] sm:$0xff]  ;;  %v77_v24 = vld [vmem:[#allocation7 + $0xa8] sm:$0xff] }
  0x2d   :  { %127 = vmatprep.subr.mxu0 %v93_v7  ;;  %320 = vmatpush3.msra.mxu1 %v97_v14  ;;  %v88_v23 = vld [vmem:[#allocation7 + $0x100] sm:$0xff]  ;;  %v75_v25 = vld [vmem:[#allocation7 + $0x98] sm:$0xff]  ;;  %v85_v26 = vld [vmem:[#allocation7 + $0xe8] sm:$0xff] }
  0x2e   :  { %128 = vmatpush1.msra.mxu0 %v92_v8  ;;  %321 = vmatprep.subr.mxu1 %v459_v0  ;;  %v74_v27 = vld [vmem:[#allocation7 + $0x90] sm:$0xff]  ;;  %v72_v28 = vld [vmem:[#allocation7 + $0x80] sm:$0xff]  ;;  %v71_v30 = vld [vmem:[#allocation7 + $0x78] sm:$0xff] }
  0x2f   :  { %129 = vmatprep.subr.mxu0 %v90_v9  ;;  %322 = vmatpush3.msra.mxu1 %v94_v17  ;;  %v82_v29 = vld [vmem:[#allocation7 + $0xd0] sm:$0xff]  ;;  %v69_v31 = vld [vmem:[#allocation7 + $0x68] sm:$0xff]  ;;  %v79_v32 = vld [vmem:[#allocation7 + $0xb8] sm:$0xff] }
  0x30   :  { %130 = vmatpush1.msra.mxu0 %v89_v11  ;;  %323 = vmatprep.subr.mxu1 %v459_v0  ;;  %v68_v33 = vld [vmem:[#allocation7 + $0x60] sm:$0xff]  ;;  %v66_v34 = vld [vmem:[#allocation7 + $0x50] sm:$0xff]  ;;  %v65_v36 = vld [vmem:[#allocation7 + $0x48] sm:$0xff] }
  0x31   :  { %131 = vmatprep.subr.mxu0 %v87_v13  ;;  %324 = vmatpush3.msra.mxu1 %v91_v20  ;;  %v76_v35 = vld [vmem:[#allocation7 + $0xa0] sm:$0xff]  ;;  %v63_v37 = vld [vmem:[#allocation7 + $0x38] sm:$0xff]  ;;  %v73_v38 = vld [vmem:[#allocation7 + $0x88] sm:$0xff] }
  0x32   :  { %132 = vmatpush1.msra.mxu0 %v86_v15  ;;  %325 = vmatprep.subr.mxu1 %v459_v0  ;;  %v62_v39 = vld [vmem:[#allocation7 + $0x30] sm:$0xff]  ;;  %v60_v40 = vld [vmem:[#allocation7 + $0x20] sm:$0xff]  ;;  %v59_v42 = vld [vmem:[#allocation7 + $0x18] sm:$0xff] }
  0x33   :  { %133 = vmatprep.subr.mxu0 %v84_v16  ;;  %326 = vmatpush3.msra.mxu1 %v88_v23  ;;  %v70_v41 = vld [vmem:[#allocation7 + $0x70] sm:$0xff]  ;;  %v57_v43 = vld [vmem:[#allocation7 + $0x8] sm:$0xff]  ;;  %v67_v44 = vld [vmem:[#allocation7 + $0x58] sm:$0xff] }
  0x34   :  { %134 = vmatpush1.msra.mxu0 %v83_v18  ;;  %327 = vmatprep.subr.mxu1 %v459_v0  ;;  %v56_v45 = vld [vmem:[#allocation7] sm:$0xff]  ;;  %v55_v46 = vld [vmem:[#allocation2] sm:$0xff]  ;;  %v61_v48 = vld [vmem:[#allocation7 + $0x28] sm:$0xff] }
  0x35   :  { %135 = vmatprep.subr.mxu0 %v81_v19  ;;  %328 = vmatpush3.msra.mxu1 %v85_v26  ;;  %v64_v47 = vld [vmem:[#allocation7 + $0x40] sm:$0xff]  ;;  %v58_v49 = vld [vmem:[#allocation7 + $0x10] sm:$0xff]  ;;  %v268_v10 = vld [vmem:[#allocation5] sm:$0xff] }
  0x36   :  { %136 = vmatpush1.msra.mxu0 %v80_v21  ;;  %329 = vmatprep.subr.mxu1 %v459_v0  ;;  %v104_v53 = vld [vmem:[%s523_s3] sm:$0x7]  ;;  %s461_s3 = smov [#allocation8]  }
  0x37   :  { %137 = vmatprep.subr.mxu0 %v78_v22  ;;  %330 = vmatpush3.msra.mxu1 %v82_v29  ;;  %v109_v55 = vrot.slane %v104_v53, %v108_v52  ;;  %v113_v56 = vrot.slane %v104_v53, %v112_v54  ;;  %v117_v2 = vrot.slane %v104_v53, %v116_v1  ;;  %s286_s5 = sshll.u32 %s461_s3, 4  ;;  %s287_s5 = int_to_ptr.vmem [resolvable:$true] %s286_s5 }
  0x38   :  { %138 = vmatpush1.msra.mxu0 %v77_v24  ;;  %331 = vmatprep.subr.mxu1 %v459_v0  ;;  %s428_s6 = scalar_lea.vmem %s287_s5, 128  ;;  %p433_p2 = scmp.lt.s32.totalorder %s287_s5, %s287_s5 }
  0x39   :  { %139 = vmatprep.subr.mxu0 %v75_v25  ;;  %332 = vmatpush3.msra.mxu1 %v79_v32  ;;  %p429_p1 = scmp.ne.s32.totalorder %s287_s5, %s428_s6  ;;  %p434_p3 = scmp.lt.s32.totalorder %s428_s6, %s428_s6 }
  0x3a   :  { %140 = vmatpush1.msra.mxu0 %v74_v27  ;;  %333 = vmatprep.subr.mxu1 %v459_v0 }
  0x3b   :  { %141 = vmatprep.subr.mxu0 %v72_v28  ;;  %334 = vmatpush3.msra.mxu1 %v76_v35  ;;  %p435_p4 = por %p434_p3, %p433_p2 }
  0x3c   :  { %142 = vmatpush1.msra.mxu0 %v71_v30  ;;  %335 = vmatprep.subr.mxu1 %v459_v0 }
  0x3d   :  { %143 = vmatprep.subr.mxu0 %v69_v31  ;;  %336 = vmatpush3.msra.mxu1 %v73_v38  ;;  %p436_p5 = pnand %p435_p4, %p429_p1 }
  0x3e   :  { %144 = vmatpush1.msra.mxu0 %v68_v33  ;;  %337 = vmatprep.subr.mxu1 %v459_v0 }
  0x3f   :  { %145 = vmatprep.subr.mxu0 %v66_v34  ;;  %338 = vmatpush3.msra.mxu1 %v70_v41 }
  0x40   :  { %146 = vmatpush1.msra.mxu0 %v65_v36  ;;  %339 = vmatprep.subr.mxu1 %v459_v0 }
  0x41   :  { %147 = vmatprep.subr.mxu0 %v63_v37  ;;  %340 = vmatpush3.msra.mxu1 %v67_v44 }
  0x42   :  { %148 = vmatpush1.msra.mxu0 %v62_v39  ;;  %341 = vmatprep.subr.mxu1 %v459_v0 }
  0x43   :  { %149 = vmatprep.subr.mxu0 %v60_v40  ;;  %342 = vmatpush3.msra.mxu1 %v64_v47 }
  0x44   :  { %150 = vmatpush1.msra.mxu0 %v59_v42  ;;  %343 = vmatprep.subr.mxu1 %v459_v0 }
  0x45   :  { %151 = vmatprep.subr.mxu0 %v57_v43  ;;  %344 = vmatpush3.msra.mxu1 %v61_v48 }
  0x46   :  { %152 = vmatpush1.msra.mxu0 %v56_v45  ;;  %345 = vmatprep.subr.mxu1 %v459_v0 }
  0x47   :  { %186 = vmatmul.mubr.f32.vlgmr.msra.gmra.mxu0 %v55_v46  ;;  %346 = vmatpush3.msra.mxu1 %v58_v49 }
  0x48   :  { %348 = vmatmul.mubr.f32.vlgmr.msra.gmra.mxu1 %v55_v46 }
 0x107   :  { %v187_v57 = vpop.f32.mrf.mxu0 }
 0x108   :  { %v188_v58 = vadd.f32 %v187_v57, %v109_v55  ;;  %v258_v63 = vpop.f32.mrf.mxu1 }
 0x109   :  { %v189_v59 = vpop.f32.mrf.mxu0  ;;  %v259_v3 = vadd.f32 %v258_v63, %v117_v2 }
 0x10a   :  { %v296_v60 = vmul.f32 -1.442695, %v188_v58  ;;  %v190_v61 = vadd.f32 %v189_v59, %v113_v56  ;;  %v349_v0 = vpop.f32.mrf.mxu1 }
 0x10c   :  { %358 = vpow2.f32 %v296_v60  ;;  %v297_v62 = vmul.f32 -1.442695, %v190_v61 }
 0x10e   :  { %360 = vpow2.f32 %v297_v62 }
 0x10f   :  { %362 = vtanh.f32 %v259_v3 }
 0x119   :  { %v359_v4 = vpop.eup %358 }
 0x11a   :  { %v265_v5 = vadd.f32 1.0, %v359_v4 }
 0x11b   :  { %v361_v6 = vpop.eup %360 }
 0x11c   :  { %364 = vrcp.f32 %v265_v5  ;;  %v273_v7 = vadd.f32 1.0, %v361_v6  ;;  %v363_v8 = vpop.eup %362 }
 0x11e   :  { %366 = vrcp.f32 %v273_v7 }
 0x129   :  { %v365_v9 = vpop.eup %364 }
 0x12a   :  { %v269_v12 = vmul.f32 %v365_v9, %v268_v10 }
 0x12b   :  { %v367_v11 = vpop.eup %366 }
 0x12c   :  { %v277_v13 = vmul.f32 %v367_v11, %v363_v8 }
 0x12e   :  { %v278_v14 = vadd.f32 %v277_v13, %v269_v12 }
 0x130   :  { %279 = vst [vmem:[#allocation8] sm:$0xff] %v278_v14 }
 0x131   :  { %439 = shalt.err (!%p436_p5)
}
 0x132   :  { %289 = dma.vmem_to_hbm [thread:$0]  %s287_s5, 128, %s524_s4, [#allocation4]  }
 0x133   :  { %452 = dma.done.wait [#allocation4], 128  }
 0x134   :  { %453 = vsyncadd [#allocation4], 4294967168 }
 0x135   :  { %293 = vsyncpa [#allocation3], 1 }
 0x136   :  { %294 = vsyncpa [#allocation6], 1 }
 0x137   :  { %295 = vsyncpa [#allocation4], 1 }

</bundles_post_ra>
